<compile_context>
chip_gen: v7x
topology: tpu7x:2x2x1
jax: 0.10.0
libtpu: 0.0.40
codegen_flags: <defaults>
</compile_context>

<pallas_src>
import functools

import jax
import jax.numpy as jnp
from jax.experimental import pallas as pl
from jax.experimental.pallas import tpu as pltpu


def _round_up(x, m):
    return (x + m - 1) // m * m


def _cdiv(a, b):
    return -(-a // b)


def _vmem_budget_bytes():
    """Per-generation VMEM budget with headroom (v7x: 64 MiB phys -> ~48 MiB)."""
    try:
        info = pltpu.get_tpu_info()
        cap = getattr(info, "vmem_capacity_bytes", None)
        if cap:
            return int(cap) * 3 // 4
    except Exception:
        pass
    return 48 * 1024 * 1024  # conservative: fits v7x, well within v5e/v6e


def _vmem_estimate(tm, tk, grid_k, n, x_isz, w_isz, r_isz, o_isz):
    w_bufs = 1 if grid_k == 1 else 2          # resident weight is single-buffered
    return (2 * tm * tk * x_isz               # x tile (double buffered)
            + w_bufs * tk * n * w_isz         # weight block
            + 2 * tm * n * r_isz              # residual tile
            + 2 * tm * n * o_isz              # output tile
            + 3 * n * 4                       # bias / gamma / beta (f32, single buf)
            + tm * n * 4                      # f32 accumulator scratch
            + 2 * tm * n * 4)                 # headroom for f32 intermediates (y, d)


def _iqm_output_kernel(x_ref, w_ref, b_ref, res_ref, gamma_ref, beta_ref,
                       o_ref, acc_ref, *, eps, n_features, matmul_dtype):
    # x_ref:     (tm, tk)  hidden_states row/K tile (native dtype)
    # w_ref:     (tk, N)   dense weight, pre-transposed to (in, out)
    # b_ref:     (1,  N)   dense bias (f32)
    # res_ref:   (tm, N)   residual (input_tensor) row tile
    # gamma_ref: (1,  N)   LayerNorm weight (f32)
    # beta_ref:  (1,  N)   LayerNorm bias (f32)
    # o_ref:     (tm, N)   output row tile
    # acc_ref:   (tm, N)   f32 accumulator scratch (persists across K steps)
    k = pl.program_id(1)

    @pl.when(k == 0)
    def _():
        acc_ref[...] = jnp.zeros_like(acc_ref)

    x = x_ref[...]
    if matmul_dtype is not None:
        x = x.astype(matmul_dtype)            # VPU cast in-kernel; no extra HBM pass
    acc_ref[...] += jnp.dot(x, w_ref[...], preferred_element_type=jnp.float32)

    @pl.when(k == pl.num_programs(1) - 1)
    def _():
        # Dropout is identity at inference time.
        # TODO(synk): training-mode dropout (prng_random_bits mask) not implemented.
        y = acc_ref[...] + b_ref[...] + res_ref[...].astype(jnp.float32)

        # LayerNorm over the hidden axis — two-pass (centered) variance in f32.
        inv_n = jnp.float32(1.0 / n_features)
        mean = jnp.sum(y, axis=-1, keepdims=True) * inv_n
        d = y - mean
        var = jnp.sum(d * d, axis=-1, keepdims=True) * inv_n
        inv = jax.lax.rsqrt(var + jnp.float32(eps))
        o_ref[...] = (d * inv * gamma_ref[...] + beta_ref[...]).astype(o_ref.dtype)


def iqm_output(hidden_states, input_tensor, dense_w, dense_b, ln_gamma, ln_beta,
               *, eps=1e-12, tm=512, matmul_dtype=jnp.bfloat16):
    """hidden_states: [B, S, K]; input_tensor: [B, S, N] -> [B, S, N].

    dense_w is the native nn.Linear weight with shape (N, K) = (out, in); it is
    transposed once here. matmul_dtype (default bf16) narrows the matmul operands;
    accumulation and LayerNorm math stay f32. matmul_dtype=None keeps full f32.
    """
    B, S, K = hidden_states.shape
    N = input_tensor.shape[-1]
    assert dense_w.shape == (N, K), "dense_w must be (hidden, intermediate)"
    M = B * S
    out_dtype = hidden_states.dtype

    x2d = hidden_states.reshape(M, K)         # streamed native dtype; cast in-kernel
    r2d = input_tensor.reshape(M, N)
    w = dense_w.T                             # one-time (K, N); constant-folds for params
    if matmul_dtype is not None:
        w = w.astype(matmul_dtype)
    b2d = dense_b.reshape(1, N).astype(jnp.float32)
    g2d = ln_gamma.reshape(1, N).astype(jnp.float32)
    bt2d = ln_beta.reshape(1, N).astype(jnp.float32)

    isz = lambda a: jnp.dtype(a.dtype).itemsize
    x_isz, w_isz, r_isz = isz(x2d), isz(w), isz(r2d)
    o_isz = jnp.dtype(out_dtype).itemsize

    budget = _vmem_budget_bytes()

    # ---- K tiling: keep the weight resident unless it would blow the VMEM budget. ----
    tk = K
    grid_k = 1
    wbytes = K * N * w_isz
    wlimit = min(24 * 1024 * 1024, budget // 3)
    if wbytes > wlimit:
        for cand in (8192, 4096, 2048, 1024, 512, 256, 128):
            if cand < K and K % cand == 0 and 2 * cand * N * w_isz <= wlimit:
                tk = cand
                grid_k = K // cand
                break

    # ---- Row tile: large, multiple of 8, >=2 grid steps so both v7x cores get work. ----
    tm = max(8, (int(tm) // 8) * 8)
    tm_eff = min(tm, _round_up(max(_cdiv(M, 2), 1), 8))
    tm_eff = max(8, (tm_eff // 8) * 8)
    while (_vmem_estimate(tm_eff, tk, grid_k, N, x_isz, w_isz, r_isz, o_isz) > budget
           and tm_eff > 8):
        tm_eff = max(8, ((tm_eff // 2) // 8) * 8)
    grid_m = _cdiv(M, tm_eff)

    # ---- BlockSpecs (single-buffer the grid-invariant operands). ----
    have_buffered = hasattr(pl, "Buffered")

    def _const_spec(shape, index_map):
        if have_buffered:
            return pl.BlockSpec(shape, index_map, pipeline_mode=pl.Buffered(1))
        return pl.BlockSpec(shape, index_map)

    w_map = lambda i, k: (k, 0)
    if grid_k == 1 and have_buffered:
        w_spec = pl.BlockSpec((tk, N), w_map, pipeline_mode=pl.Buffered(1))
    else:
        w_spec = pl.BlockSpec((tk, N), w_map)

    # ---- Cost hint for XLA scheduling around the custom call. ----
    bytes_accessed = (M * K * x_isz + K * N * w_isz + M * N * r_isz
                      + 3 * N * 4 + M * N * o_isz)
    cost = pl.CostEstimate(flops=2 * M * K * N, transcendentals=M,
                           bytes_accessed=int(bytes_accessed))

    est = _vmem_estimate(tm_eff, tk, grid_k, N, x_isz, w_isz, r_isz, o_isz)
    vmem_limit = int(min(max(int(est * 1.25), 32 * 1024 * 1024), budget))

    kernel = functools.partial(_iqm_output_kernel, eps=float(eps),
                               n_features=N, matmul_dtype=matmul_dtype)

    out2d = pl.pallas_call(
        kernel,
        out_shape=jax.ShapeDtypeStruct((M, N), out_dtype),
        grid_spec=pltpu.PrefetchScalarGridSpec(
            num_scalar_prefetch=0,
            grid=(grid_m, grid_k),
            in_specs=[
                pl.BlockSpec((tm_eff, tk), lambda i, k: (i, k)),   # hidden_states tile
                w_spec,                                            # dense weight (K,N)
                _const_spec((1, N), lambda i, k: (0, 0)),          # dense bias
                pl.BlockSpec((tm_eff, N), lambda i, k: (i, 0)),    # residual rows
                _const_spec((1, N), lambda i, k: (0, 0)),          # LN gamma
                _const_spec((1, N), lambda i, k: (0, 0)),          # LN beta
            ],
            out_specs=pl.BlockSpec((tm_eff, N), lambda i, k: (i, 0)),
            scratch_shapes=[pltpu.VMEM((tm_eff, N), jnp.float32)],
        ),
        compiler_params=pltpu.CompilerParams(
            dimension_semantics=("parallel", "arbitrary"),
            vmem_limit_bytes=vmem_limit),
        cost_estimate=cost,
    )(x2d, w, b2d, r2d, g2d, bt2d)

    return out2d.reshape(B, S, N)


def _reference(hidden_states, input_tensor, dense_w, dense_b, ln_gamma, ln_beta, eps):
    y = hidden_states @ dense_w.T + dense_b + input_tensor
    mu = jnp.mean(y, axis=-1, keepdims=True)
    var = jnp.mean((y - mu) ** 2, axis=-1, keepdims=True)
    return (y - mu) * jax.lax.rsqrt(var + eps) * ln_gamma + ln_beta


if __name__ == "__main__":
    # Small config consistent with the module: intermediate_size=256, hidden_size=128.
    batch, seq = 2, 8
    intermediate_size, hidden_size = 256, 128
    eps = 1e-12

    key = jax.random.PRNGKey(0)
    k_hs, k_in, k_w, k_b, _, _ = jax.random.split(key, 6)

    hidden_states = jax.random.normal(k_hs, (batch, seq, intermediate_size), jnp.float32)
    input_tensor = jax.random.normal(k_in, (batch, seq, hidden_size), jnp.float32)

    # Deterministic synthetic parameters (shapes match nn.Linear / nn.LayerNorm).
    dense_w = jax.random.normal(k_w, (hidden_size, intermediate_size), jnp.float32) * 0.02
    dense_b = jax.random.normal(k_b, (hidden_size,), jnp.float32) * 0.02
    ln_gamma = jnp.ones((hidden_size,), jnp.float32)
    ln_beta = jnp.zeros((hidden_size,), jnp.float32)

    ref = _reference(hidden_states, input_tensor, dense_w, dense_b, ln_gamma, ln_beta, eps)

    # Default bf16-operand path (f32 accumulate / f32 LayerNorm) — looser tolerance.
    out_bf16 = iqm_output(hidden_states, input_tensor, dense_w, dense_b,
                          ln_gamma, ln_beta, eps=eps)
    jax.block_until_ready(out_bf16)
    assert out_bf16.shape == (batch, seq, hidden_size)
    assert jnp.allclose(out_bf16, ref, atol=3e-2, rtol=3e-2)

    # Full-f32 path — tight tolerance.
    out_f32 = iqm_output(hidden_states, input_tensor, dense_w, dense_b,
                         ln_gamma, ln_beta, eps=eps, matmul_dtype=None)
    jax.block_until_ready(out_f32)
    assert jnp.allclose(out_f32, ref, atol=1e-4, rtol=1e-4)

    # Ragged-M case (M = 14, not a multiple of the row tile): exercises the
    # unpadded grid with masked OOB stores on the last block.
    hs_r = hidden_states[:, :7]
    in_r = input_tensor[:, :7]
    ref_r = _reference(hs_r, in_r, dense_w, dense_b, ln_gamma, ln_beta, eps)
    out_r = iqm_output(hs_r, in_r, dense_w, dense_b, ln_gamma, ln_beta,
                       eps=eps, matmul_dtype=None)
    jax.block_until_ready(out_r)
    assert out_r.shape == (batch, 7, hidden_size)
    assert jnp.allclose(out_r, ref_r, atol=1e-4, rtol=1e-4)

    print("KERNEL_OK")
</pallas_src>

<mosaic_0001>
module attributes {stable_mosaic.version = 11 : i64} {
  func.func @_iqm_output_kernel(%arg0: i32, %arg1: i32, %arg2: memref<8x256xf32, #tpu.memory_space<vmem>>, %arg3: memref<256x128xbf16, #tpu.memory_space<vmem>>, %arg4: memref<1x128xf32, #tpu.memory_space<vmem>>, %arg5: memref<8x128xf32, #tpu.memory_space<vmem>>, %arg6: memref<1x128xf32, #tpu.memory_space<vmem>>, %arg7: memref<1x128xf32, #tpu.memory_space<vmem>>, %arg8: memref<8x128xf32, #tpu.memory_space<vmem>>, %arg9: memref<8x128xf32, #tpu.memory_space<vmem>>) attributes {dimension_semantics = [#tpu.dimension_semantics<parallel>, #tpu.dimension_semantics<arbitrary>], iteration_bounds = array<i64: 2, 1>, scalar_prefetch = 0 : i64, scratch_operands = 1 : i64, tpu.core_type = #tpu.core_type<tc>, window_params = [{transform_indices = @transform_0, window_bounds = array<i64: 8, 256>}, {pipeline_mode = #tpu.pipeline_mode<synchronous>, transform_indices = @transform_1, window_bounds = array<i64: 256, 128>}, {pipeline_mode = #tpu.pipeline_mode<synchronous>, transform_indices = @transform_2, window_bounds = array<i64: 1, 128>}, {transform_indices = @transform_3, window_bounds = array<i64: 8, 128>}, {pipeline_mode = #tpu.pipeline_mode<synchronous>, transform_indices = @transform_4, window_bounds = array<i64: 1, 128>}, {pipeline_mode = #tpu.pipeline_mode<synchronous>, transform_indices = @transform_5, window_bounds = array<i64: 1, 128>}, {transform_indices = @transform_6, window_bounds = array<i64: 8, 128>}]} {
    %c0_i32 = arith.constant 0 : i32
    %0 = arith.cmpi eq, %arg1, %c0_i32 : i32
    %1 = arith.extui %0 : i1 to i32
    %c0_i32_0 = arith.constant 0 : i32
    %2 = arith.cmpi ne, %1, %c0_i32_0 : i32
    scf.if %2 {
      %cst_10 = arith.constant 0.000000e+00 : f32
      %13 = vector.broadcast %cst_10 : f32 to vector<8x128xf32>
      %c0_11 = arith.constant 0 : index
      %c0_12 = arith.constant 0 : index
      %14 = vector.load %arg9[%c0_11, %c0_12] : memref<8x128xf32, #tpu.memory_space<vmem>>, vector<8x128xf32>
      tpu.vector_store %arg9[%c0_11, %c0_12], %13 {strides = array<i32>} : memref<8x128xf32, #tpu.memory_space<vmem>>, vector<8x128xf32>,
    } else {
    }
    %c0 = arith.constant 0 : index
    %c0_1 = arith.constant 0 : index
    %3 = vector.load %arg2[%c0, %c0_1] : memref<8x256xf32, #tpu.memory_space<vmem>>, vector<8x256xf32>
    %4 = arith.truncf %3 : vector<8x256xf32> to vector<8x256xbf16>
    %c0_2 = arith.constant 0 : index
    %c0_3 = arith.constant 0 : index
    %5 = vector.load %arg9[%c0_2, %c0_3] : memref<8x128xf32, #tpu.memory_space<vmem>>, vector<8x128xf32>
    %c0_4 = arith.constant 0 : index
    %c0_5 = arith.constant 0 : index
    %6 = vector.load %arg3[%c0_4, %c0_5] : memref<256x128xbf16, #tpu.memory_space<vmem>>, vector<256x128xbf16>
    %cst = arith.constant dense<0.000000e+00> : vector<8x128xf32>
    %7 = tpu.matmul %4, %6, %cst {dimension_numbers = #tpu.dot_dimension_numbers<[1], [0], [0], [1], [0, 0, 1, 1], [], []>} : vector<8x256xbf16>, vector<256x128xbf16>, vector<8x128xf32> -> vector<8x128xf32>
    %8 = arith.addf %5, %7 : vector<8x128xf32>
    %c0_6 = arith.constant 0 : index
    %c0_7 = arith.constant 0 : index
    %9 = vector.load %arg9[%c0_6, %c0_7] : memref<8x128xf32, #tpu.memory_space<vmem>>, vector<8x128xf32>
    tpu.vector_store %arg9[%c0_6, %c0_7], %8 {strides = array<i32>} : memref<8x128xf32, #tpu.memory_space<vmem>>, vector<8x128xf32>,
    %c0_i32_8 = arith.constant 0 : i32
    %10 = arith.cmpi eq, %arg1, %c0_i32_8 : i32
    %11 = arith.extui %10 : i1 to i32
    %c0_i32_9 = arith.constant 0 : i32
    %12 = arith.cmpi ne, %11, %c0_i32_9 : i32
    scf.if %12 {
      %c0_10 = arith.constant 0 : index
      %c0_11 = arith.constant 0 : index
      %13 = vector.load %arg9[%c0_10, %c0_11] : memref<8x128xf32, #tpu.memory_space<vmem>>, vector<8x128xf32>
      %c0_12 = arith.constant 0 : index
      %c0_13 = arith.constant 0 : index
      %14 = vector.load %arg4[%c0_12, %c0_13] : memref<1x128xf32, #tpu.memory_space<vmem>>, vector<1x128xf32>
      %15 = vector.broadcast %14 : vector<1x128xf32> to vector<8x128xf32>
      %16 = arith.addf %13, %15 : vector<8x128xf32>
      %c0_14 = arith.constant 0 : index
      %c0_15 = arith.constant 0 : index
      %17 = vector.load %arg5[%c0_14, %c0_15] : memref<8x128xf32, #tpu.memory_space<vmem>>, vector<8x128xf32>
      %18 = arith.addf %16, %17 : vector<8x128xf32>
      %cst_16 = arith.constant dense<0.000000e+00> : vector<8xf32>
      %19 = vector.multi_reduction <add>, %18, %cst_16 [1] : vector<8x128xf32> to vector<8xf32>
      %20 = vector.shape_cast %19 : vector<8xf32> to vector<8x1xf32>
      %cst_17 = arith.constant 7.812500e-03 : f32
      %21 = vector.broadcast %cst_17 : f32 to vector<8x1xf32>
      %22 = arith.mulf %20, %21 : vector<8x1xf32>
      %23 = vector.broadcast %22 : vector<8x1xf32> to vector<8x128xf32>
      %24 = arith.subf %18, %23 : vector<8x128xf32>
      %25 = arith.mulf %24, %24 : vector<8x128xf32>
      %cst_18 = arith.constant dense<0.000000e+00> : vector<8xf32>
      %26 = vector.multi_reduction <add>, %25, %cst_18 [1] : vector<8x128xf32> to vector<8xf32>
      %27 = vector.shape_cast %26 : vector<8xf32> to vector<8x1xf32>
      %cst_19 = arith.constant 7.812500e-03 : f32
      %28 = vector.broadcast %cst_19 : f32 to vector<8x1xf32>
      %29 = arith.mulf %27, %28 : vector<8x1xf32>
      %cst_20 = arith.constant 9.99999996E-13 : f32
      %30 = vector.broadcast %cst_20 : f32 to vector<8x1xf32>
      %31 = arith.addf %29, %30 : vector<8x1xf32>
      %32 = math.rsqrt %31 : vector<8x1xf32>
      %33 = vector.broadcast %32 : vector<8x1xf32> to vector<8x128xf32>
      %34 = arith.mulf %24, %33 : vector<8x128xf32>
      %c0_21 = arith.constant 0 : index
      %c0_22 = arith.constant 0 : index
      %35 = vector.load %arg6[%c0_21, %c0_22] : memref<1x128xf32, #tpu.memory_space<vmem>>, vector<1x128xf32>
      %36 = vector.broadcast %35 : vector<1x128xf32> to vector<8x128xf32>
      %37 = arith.mulf %34, %36 : vector<8x128xf32>
      %c0_23 = arith.constant 0 : index
      %c0_24 = arith.constant 0 : index
      %38 = vector.load %arg7[%c0_23, %c0_24] : memref<1x128xf32, #tpu.memory_space<vmem>>, vector<1x128xf32>
      %39 = vector.broadcast %38 : vector<1x128xf32> to vector<8x128xf32>
      %40 = arith.addf %37, %39 : vector<8x128xf32>
      %c0_25 = arith.constant 0 : index
      %c0_26 = arith.constant 0 : index
      %41 = vector.load %arg8[%c0_25, %c0_26] : memref<8x128xf32, #tpu.memory_space<vmem>>, vector<8x128xf32>
      tpu.vector_store %arg8[%c0_25, %c0_26], %40 {strides = array<i32>} : memref<8x128xf32, #tpu.memory_space<vmem>>, vector<8x128xf32>,
    } else {
    }
    return
  }
  func.func @transform_0(%arg0: i32, %arg1: i32) -> (i32, i32) {
    %c0_i32 = arith.constant 0 : i32
    return %arg0, %arg1 : i32, i32
  }
  func.func @transform_1(%arg0: i32, %arg1: i32) -> (i32, i32) {
    %c0_i32 = arith.constant 0 : i32
    %c0_i32_0 = arith.constant 0 : i32
    return %arg1, %c0_i32 : i32, i32
  }
  func.func @transform_2(%arg0: i32, %arg1: i32) -> (i32, i32) {
    %c0_i32 = arith.constant 0 : i32
    %c0_i32_0 = arith.constant 0 : i32
    %c0_i32_1 = arith.constant 0 : i32
    return %c0_i32, %c0_i32_0 : i32, i32
  }
  func.func @transform_3(%arg0: i32, %arg1: i32) -> (i32, i32) {
    %c0_i32 = arith.constant 0 : i32
    %c0_i32_0 = arith.constant 0 : i32
    return %arg0, %c0_i32 : i32, i32
  }
  func.func @transform_4(%arg0: i32, %arg1: i32) -> (i32, i32) {
    %c0_i32 = arith.constant 0 : i32
    %c0_i32_0 = arith.constant 0 : i32
    %c0_i32_1 = arith.constant 0 : i32
    return %c0_i32, %c0_i32_0 : i32, i32
  }
  func.func @transform_5(%arg0: i32, %arg1: i32) -> (i32, i32) {
    %c0_i32 = arith.constant 0 : i32
    %c0_i32_0 = arith.constant 0 : i32
    %c0_i32_1 = arith.constant 0 : i32
    return %c0_i32, %c0_i32_0 : i32, i32
  }
  func.func @transform_6(%arg0: i32, %arg1: i32) -> (i32, i32) {
    %c0_i32 = arith.constant 0 : i32
    %c0_i32_0 = arith.constant 0 : i32
    return %arg0, %c0_i32 : i32, i32
  }
}

</mosaic_0001>

<bundles_post_ra>
// kernel: tpu_custom_call.1
= control target key start
LH: loop header
LB: loop body
LE: loop exit
PB: predicated region body
PF: predicated region fallthrough
CT: control target
= control target key end

     0   :  { %s1353_s0 = inlined_call_operand.hbm [shape: f32[16,256], index: 0, kind: input, shape index: {}]   ;;  %s1354_s1 = inlined_call_operand.hbm [shape: bf16[256,128], index: 1, kind: input, shape index: {}]   ;;  %s1355_s2 = inlined_call_operand.vmem [shape: f32[1,128], index: 2, kind: input, shape index: {}]   ;;  %s1356_s3 = inlined_call_operand.hbm [shape: f32[16,128], index: 3, kind: input, shape index: {}]   ;;  %s1357_s4 = inlined_call_operand.vmem [shape: f32[1,128], index: 4, kind: input, shape index: {}]   ;;  %s1358_s5 = inlined_call_operand.vmem [shape: f32[1,128], index: 5, kind: input, shape index: {}]   ;;  %s1359_s6 = inlined_call_operand.hbm [shape: f32[16,128], index: 6, kind: output, shape index: {}]  }
   0x1   :  { %1370 = sst [smem:[#allocation18_spill]] %s1353_s0 }
   0x2   :  { %11 = vsyncpa [#allocation4], 0 }
   0x3   :  { %13 = vsyncpa [#allocation4 + $0x1], 0 }
   0x4   :  { %14 = vsyncpa [#allocation7], 0 }
   0x5   :  { %15 = vsyncpa [#allocation5], 0 }
   0x6   :  { %17 = vsyncpa [#allocation5 + $0x1], 0  ;;  %s1073_s21 = smov 0   ;;  %s1075_s22 = smov 0  }
   0x7   :  { %s1077_s23 = smov 0   ;;  %s1079_s24 = smov 0  }
   0x8   :  { %s1081_s25 = smov 0   ;;  %s1083_s26 = smov 0  }
   0x9 LB: > { %1371 = sst [smem:[#allocation14_spill]] %s1018_s23  ;;  %s35_s27 = sadd.s32 1, %s1026_s25  ;;  %s1030_s26 = sphi %s1083_s26, %s23_s26   ;;  %s1026_s25 = sphi %s1081_s25, %s1395_s25   ;;  %s1022_s24 = sphi %s1079_s24, %s1394_s24   ;;  %s1018_s23 = sphi %s1077_s23, %s1393_s23   ;;  %s1014_s22 = sphi %s1075_s22, %s1397_s22   ;;  %s1010_s21 = sphi %s1073_s21, %s1396_s21  }
   0xa   : > { %1372 = sst [smem:[#allocation15_spill]] %s1026_s25  ;;  %s44_s28 = sadd.s32 1, %s1018_s23 }
   0xb   : > { %p37_p0 = scmp.ge.s32.totalorder %s35_s27, 2  ;;  %p51_p1 = scmp.ne.s32.totalorder %s1018_s23, %s1014_s22 }
   0xc   : > { %p52_p2 = scmp.eq.s32.totalorder %s1030_s26, 0  ;;  %p780_p5 = scmp.lt.s32.totalorder %s1030_s26, 2 }
   0xd   : > { %s1399_s27 = smov (%p37_p0, %s35_s27), 0  ;;  %s247_s30 = sand.u32 1, %s1030_s26  }
   0xe   : > { %1373 = sst [smem:[#allocation16_spill]] %s1399_s27  ;;  %p53_p4 = por %p52_p2, %p51_p1 }
   0xf   : > { %s39_s29 = ssub.s32 %s1026_s25, %s1399_s27  ;;  %s249_s7 = sand.u32 1, %s1018_s23  }
  0x10   : > { %p42_p6 = scmp.eq.s32.totalorder %s39_s29, 0  ;;  %s731_s8 = sshll.u32 %s1026_s25, 8 }
  0x11   : > { %s698_s10 = sshll.u32 %s249_s7, 4  ;;  %s1375_s0 = sld [smem:[#allocation18_spill]] }
  0x12   : > { %s1121_s9 = scalar_select %p42_p6, %s1018_s23, %s44_s28  }
  0x13   : > { %p1130_p7 = pnand %p780_p5, %p53_p4  ;;  %s251_s15 = scalar_lea.vmem [#allocation3], %s698_s10 }
  0x14   : > { %1374 = sst [smem:[#allocation17_spill]] %s1121_s9  ;;  %s261_s16 = sshll.u32 %s251_s15, 4  ;;  %s1134_s16 = int_to_ptr.vmem [resolvable:$true] %s261_s16 }
  0x15   : > { %s1376_s14 = scalar_select %p1130_p7, 1, 0 }
  0x16   : > { %s1136_s17 = scalar_lea.sflag [#allocation4], %s247_s30  ;;  %p1364_p9 = pneg %p1130_p7 }
  0x17   : > { %s1128_s13 = scalar_lea.hbm %s1375_s0, %s731_s8  ;;  %s857_s28 = scalar_lea.hbm %s1375_s0, 512 }
  0x18   : > { %s852_s18 = scalar_lea.hbm %s1128_s13, 256  ;;  %p858_p12 = scmp.lt.u32.totalorder %s1128_s13, %s1375_s0 }
  0x19   : > { %p853_p8 = scmp.ne.s32.totalorder %s1128_s13, %s852_s18  ;;  %p859_p13 = scmp.lt.u32.totalorder %s857_s28, %s852_s18 }
  0x1a   : > { %p861_p2 = scmp.lt.u32.totalorder %s852_s18, %s1128_s13 }
  0x1b   : > { %p855_p10 = pnand %p1364_p9, %p853_p8  ;;  %p860_p0 = por %p859_p13, %p858_p12 }
  0x1d   : > { %p856_p11 = pneg %p855_p10  ;;  %p862_p4 = por %p861_p2, %p860_p0 }
  0x1f   : > { %p863_p5 = pnand %p862_p4, %p856_p11 }
  0x21   : > { %866 = shalt.err (!%p863_p5)
}
  0x22   : > { %s867_s30 = scalar_lea.vmem %s1134_s16, 256  ;;  %s1032_s10 = smov [#allocation3]  }
  0x23   : > { %p868_p6 = scmp.ne.s32.totalorder %s1134_s16, %s867_s30  ;;  %s872_s11 = sshll.u32 %s1032_s10, 4  ;;  %s873_s11 = int_to_ptr.vmem [resolvable:$false] %s872_s11 }
  0x24   : > { %s874_s12 = scalar_lea.vmem %s873_s11, 512  ;;  %p875_p3 = scmp.lt.s32.totalorder %s1134_s16, %s873_s11 }
  0x25   : > { %p870_p8 = pnand %p868_p6, %p1364_p9  ;;  %p876_p12 = scmp.lt.s32.totalorder %s874_s12, %s867_s30 }
  0x27   : > { %p871_p10 = pneg %p870_p8  ;;  %p877_p13 = por %p876_p12, %p875_p3 }
  0x29   : > { %p878_p0 = pnand %p877_p13, %p871_p10 }
  0x2b   : > { %881 = shalt.err (!%p878_p0)
}
  0x2c   : > { %771 = dma.hbm_to_vmem [thread:$0]  (!%p1130_p7), %s1128_s13, 256, %s1134_s16, %s1136_s17  }
  0x2d   : > { %s1165_s15 = sadd.s32 4294967295, %s1030_s26   ;;  %s694_s18 = sadd.s32 4294967294, %s1030_s26  }
  0x2e   : > { %p57_p3 = scmp.ne.s32.totalorder %s1014_s22, %s1010_s21  ;;  %p1363_p11 = scmp.eq.s32.totalorder %s1165_s15, 0 }
  0x2f   : > { %p196_p2 = scmp.eq.s32.totalorder %s1165_s15, 1  ;;  %p202_p4 = scmp.eq.s32.totalorder %s694_s18, 1 }
  0x30   : > { %p1174_p5 = por %p1363_p11, %p57_p3  ;;  %p695_p6 = scmp.ge.s32.totalorder %s1030_s26, 1 }
  0x31   : > { %p1182_p8 = por %p196_p2, %p51_p1  ;;  %p1186_p10 = por %p202_p4, %p57_p3 }
  0x32   : > { %s1377_s19 = scalar_select %p1174_p5, 1, 0 }
  0x33   : > { %s1378_s13 = scalar_select %p1182_p8, 1, 0 }
  0x34   : > { %s1379_s16 = scalar_select %p1186_p10, 1, 0 }
  0x35   : > { %p209_p12 = scmp.lt.s32.totalorder %s1030_s26, 3  ;;  %s701_s20 = sshll.u32 %s249_s7, 3 }
  0x36   : > { %s1033_s29 = smov [#allocation6]   ;;  %s702_s30 = sshll.u32 %s1026_s25, 7 }
  0x37   : > { %p1193_p13 = pnand %p695_p6, %p209_p12  ;;  %s224_s8 = sshll.u32 %s1033_s29, 4  ;;  %s1197_s8 = int_to_ptr.vmem [resolvable:$true] %s224_s8 }
  0x38   : > { %s272_s10 = scalar_lea.vmem [#allocation8], %s701_s20  ;;  %s1211_s0 = scalar_lea.hbm %s1356_s3, %s702_s30 }
  0x39   : > { %s1380_s28 = scalar_select %p1193_p13, 1, 0 }
  0x3a   : > { %p764_p1 = pneg %p1193_p13  ;;  %s279_s11 = sshll.u32 %s272_s10, 4  ;;  %s1213_s11 = int_to_ptr.vmem [resolvable:$true] %s279_s11 }
  0x3b   : > { %s882_s9 = scalar_lea.hbm %s1354_s1, 2048 }
  0x3c   : > { %p1204_p0 = pnand %p764_p1, %p1363_p11  ;;  %p883_p3 = scmp.ne.s32.totalorder %s1354_s1, %s882_s9 }
  0x3d   : > { %p889_p12 = scmp.lt.u32.totalorder %s882_s9, %s1354_s1 }
  0x3e   : > { %p884_p2 = pneg %p1204_p0 }
  0x40   : > { %p885_p4 = pnand %p884_p2, %p883_p3 }
  0x42   : > { %p886_p6 = pneg %p885_p4 }
  0x44   : > { %p891_p1 = pnand %p889_p12, %p886_p6 }
  0x46   : > { %894 = shalt.err (!%p891_p1)
}
  0x47   : > { %s895_s30 = scalar_lea.vmem %s1197_s8, 2048  ;;  %p903_p8 = scmp.lt.s32.totalorder %s1197_s8, %s1197_s8 }
  0x48   : > { %p896_p11 = scmp.ne.s32.totalorder %s1197_s8, %s895_s30  ;;  %p904_p5 = scmp.lt.s32.totalorder %s895_s30, %s895_s30 }
  0x4a   : > { %p898_p9 = pnand %p896_p11, %p884_p2  ;;  %p905_p13 = por %p904_p5, %p903_p8 }
  0x4c   : > { %p899_p10 = pneg %p898_p9 }
  0x4e   : > { %p906_p7 = pnand %p905_p13, %p899_p10 }
  0x50   : > { %909 = shalt.err (!%p906_p7)
}
  0x51   : > { %s1034_s25 = smov 64   ;;  %s1035_s23 = smov 4  }
  0x52   : > { %767 = dma.hbm_to_vmem [thread:$0]  (!%p1204_p0), %s1354_s1, 2048, %s1197_s8, [#allocation7], %s1034_s25, %s1034_s25, %s1035_s23  }
  0x53   : > { %s910_s7 = scalar_lea.hbm %s1211_s0, 128  ;;  %p1382_p11 = scmp.ne.s32.totalorder %s1376_s14, 0 }
  0x54   : > { %p911_p9 = scmp.ne.s32.totalorder %s1211_s0, %s910_s7  ;;  %s915_s20 = scalar_lea.hbm %s1356_s3, 256 }
  0x55   : > { %p1383_p5 = pneg %p1382_p11  ;;  %p916_p10 = scmp.lt.u32.totalorder %s1211_s0, %s1356_s3 }
  0x56   : > { %p917_p13 = scmp.lt.u32.totalorder %s915_s20, %s910_s7  ;;  %p919_p2 = scmp.lt.u32.totalorder %s910_s7, %s1211_s0 }
  0x57   : > { %p913_p8 = pnand %p911_p9, %p1383_p5 }
  0x58   : > { %p918_p3 = por %p917_p13, %p916_p10 }
  0x59   : > { %p914_p7 = pneg %p913_p8 }
  0x5a   : > { %p920_p4 = por %p919_p2, %p918_p3 }
  0x5c   : > { %p921_p6 = pnand %p920_p4, %p914_p7 }
  0x5e   : > { %924 = shalt.err (!%p921_p6)
}
  0x5f   : > { %s925_s8 = scalar_lea.vmem %s1213_s11, 128  ;;  %p1384_p12 = pmov %p1383_p5 }
  0x60   : > { %p926_p0 = scmp.ne.s32.totalorder %s1213_s11, %s925_s8  ;;  %s1036_s12 = smov [#allocation8]  }
  0x61   : > { %s930_s25 = sshll.u32 %s1036_s12, 4  ;;  %s931_s25 = int_to_ptr.vmem [resolvable:$false] %s930_s25 }
  0x62   : > { %p928_p1 = pnand %p926_p0, %p1384_p12  ;;  %s932_s23 = scalar_lea.vmem %s931_s25, 256 }
  0x63   : > { %p933_p5 = scmp.lt.s32.totalorder %s1213_s11, %s931_s25  ;;  %p934_p8 = scmp.lt.s32.totalorder %s932_s23, %s925_s8 }
  0x64   : > { %p929_p9 = pneg %p928_p1 }
  0x65   : > { %p935_p10 = por %p934_p8, %p933_p5 }
  0x67   : > { %p936_p13 = pnand %p935_p10, %p929_p9 }
  0x69   : > { %939 = shalt.err (!%p936_p13)
}
  0x6a   : > { %774 = dma.hbm_to_vmem [thread:$0]  (!%p1382_p11), %s1211_s0, 128, %s1213_s11, %s1136_s17  }
  0x6b   : > { %p1385_p7 = scmp.ne.s32.totalorder %s1380_s28, 0 }
  0x6c   : > { %s290_s27 = sand.u32 (!%p1385_p7), 1, %s1165_s15   ;;  %s1264_s9 = sand.u32 (!%p1385_p7), 1, %s1014_s22  }
  0x6d   : > { %288 = sbr.rel (%p1385_p7) target bundleno = 700 (0x2bc), region = 44  ;;  %s704_s7 = sshll.u32 (!%p1385_p7), %s1264_s9, 4 }
  0x6e   : > { %s291_s18 = scalar_lea.sflag (!%p1385_p7), [#allocation4], %s290_s27  ;;  %s1267_s29 = scalar_lea.vmem (!%p1385_p7), [#allocation3], %s704_s7 }
  0x6f   : > { %p1386_p3 = scmp.ne.s32.totalorder (!%p1385_p7), %s1377_s19, 0 }
  0x74   : > { %993 = dma.done.wait (%p1386_p3), %s291_s18, 256  }
  0x75   : > { %995 = vsyncadd (%p1386_p3), %s291_s18, 4294967040  ;;  %p1387_p11 = scmp.eq.s32.totalorder %s1165_s15, 0 }
  0x77   : > { %997 = dma.done.wait (%p1387_p11), [#allocation7], 2048   ;;  %p1388_p2 = pmov %p1387_p11 }
  0x78   : > { %s706_s0 = sshll.u32 %s1264_s9, 3 }
  0x79   : > { %999 = vsyncadd (%p1388_p2), [#allocation7], 4294965248  ;;  %s1280_s14 = scalar_lea.vmem [#allocation8], %s706_s0 }
  0x7a   : > { %1001 = dma.done.wait (%p1386_p3), %s291_s18, 128  }
  0x7b   : > { %1003 = vsyncadd (%p1386_p3), %s291_s18, 4294967168  ;;  %v834_v0 = vld [vmem:[#allocation6 + $0x40] sm:$0xff]   ;;  %v836_v2 = vld [vmem:[#allocation6 + $0x48] sm:$0xff]   ;;  %s728_s10 = sshll.u32 %s1022_s24, 7  ;;  %s340_s30 = scalar_lea.vmem [#allocation9], %s706_s0 }
  0x7c   : > { %v835_v1 = vld [vmem:[#allocation6] sm:$0xff]   ;;  %732 = vmatprep.subr.bf16.mxu0 %v834_v0  ;;  %v837_v3 = vld [vmem:[#allocation6 + $0x8] sm:$0xff]   ;;  %v838_v4 = vld [vmem:[#allocation6 + $0x50] sm:$0xff]   ;;  %s580_s8 = sshll.u32 %s340_s30, 4  ;;  %s1304_s23 = scalar_lea.hbm %s1359_s6, %s728_s10  ;;  %s1306_s8 = int_to_ptr.vmem [resolvable:$true] %s580_s8 }
  0x7d   : > { %733 = vmatpush3.bf16.msra.mxu0 %v835_v1  ;;  %v839_v5 = vld [vmem:[#allocation6 + $0x10] sm:$0xff]   ;;  %v840_v6 = vld [vmem:[#allocation6 + $0x58] sm:$0xff]   ;;  %v842_v8 = vld [vmem:[#allocation6 + $0x60] sm:$0xff]   ;;  %s567_s27 = scalar_lea.sflag [#allocation5], %s1264_s9  ;;  %s940_s7 = scalar_lea.vmem %s1306_s8, 128 }
  0x7e   : > { %734 = vmatprep.subr.bf16.mxu0 %v836_v2  ;;  %v841_v7 = vld [vmem:[#allocation6 + $0x18] sm:$0xff]   ;;  %v843_v9 = vld [vmem:[#allocation6 + $0x20] sm:$0xff]   ;;  %v844_v10 = vld [vmem:[#allocation6 + $0x68] sm:$0xff]   ;;  %p941_p4 = scmp.ne.s32.totalorder %s1306_s8, %s940_s7  ;;  %p1389_p6 = scmp.ne.s32.totalorder %s1378_s13, 0 }
  0x7f   : > { %v350_v11 = vld [vmem:[%s1267_s29 + $0x8] sm:$0xff]  ;;  %v846_v14 = vld [vmem:[#allocation6 + $0x70] sm:$0xff]   ;;  %v724_v22 = vld [vmem:[%s1355_s2] ss:$0 sm:$0xff]  ;;  %s1037_s24 = smov [#allocation9]  }
  0x80   : > { %v352_v12 = vpack.c.bf16 %v350_v11, %v350_v11  ;;  %v845_v13 = vld [vmem:[#allocation6 + $0x28] sm:$0xff]   ;;  %v847_v15 = vld [vmem:[#allocation6 + $0x30] sm:$0xff]   ;;  %v848_v16 = vld [vmem:[#allocation6 + $0x78] sm:$0xff]   ;;  %p942_p0 = pnand %p941_p4, %p1389_p6  ;;  %s944_s18 = sshll.u32 %s1037_s24, 4  ;;  %s945_s18 = int_to_ptr.vmem [resolvable:$false] %s944_s18 }
  0x81   : > { %735 = vmatpush3.bf16.msra.mxu0 %v837_v3  ;;  %v849_v17 = vld [vmem:[#allocation6 + $0x38] sm:$0xff]   ;;  %v349_v18 = vld [vmem:[%s1267_s29] sm:$0xff]  ;;  %s946_s29 = scalar_lea.vmem %s945_s18, 256  ;;  %p947_p1 = scmp.lt.s32.totalorder %s1306_s8, %s945_s18 }
  0x82   : > { %736 = vmatprep.subr.bf16.mxu0 %v838_v4  ;;  %514 = vmatprep.mubr.bf16.mxu0 %v352_v12  ;;  %v351_v19 = vpack.c.bf16 %v349_v18, %v349_v18  ;;  %v536_v26 = vld [vmem:[%s1280_s14] sm:$0xff]  ;;  %p943_p12 = pneg %p942_p0  ;;  %p948_p9 = scmp.lt.s32.totalorder %s946_s29, %s940_s7 }
  0x83   : > { %v725_v37 = vld [vmem:[%s1357_s4] ss:$0 sm:$0xff] }
  0x84   : > { %v726_v39 = vld [vmem:[%s1358_s5] ss:$0 sm:$0xff]  ;;  %p949_p5 = por %p948_p9, %p947_p1 }
  0x85   : > { %737 = vmatpush3.bf16.msra.mxu0 %v839_v5 }
  0x86   : > { %738 = vmatprep.subr.bf16.mxu0 %v840_v6  ;;  %p950_p8 = pnand %p949_p5, %p943_p12 }
  0x89   : > { %739 = vmatpush3.bf16.msra.mxu0 %v841_v7 }
  0x8a   : > { %740 = vmatprep.subr.bf16.mxu0 %v842_v8 }
  0x8d   : > { %741 = vmatpush3.bf16.msra.mxu0 %v843_v9 }
  0x8e   : > { %742 = vmatprep.subr.bf16.mxu0 %v844_v10 }
  0x91   : > { %743 = vmatpush3.bf16.msra.mxu0 %v845_v13 }
  0x92   : > { %744 = vmatprep.subr.bf16.mxu0 %v846_v14 }
  0x95   : > { %745 = vmatpush3.bf16.msra.mxu0 %v847_v15 }
  0x96   : > { %746 = vmatprep.subr.bf16.mxu0 %v848_v16 }
  0x99   : > { %747 = vmatpush3.bf16.msra.mxu0 %v849_v17 }
  0x9c   : > { %515 = vmatmul.mubr.bf16.vlgmr.msra.gmra.mrb[0].mxu0 %v351_v19 }
 0x16f   : > { %v748_v20 = vpop.f32.mrb[0].mxu0 }
 0x170   : > { %v749_v21 = vpop.f32.mrb[1].mxu0 }
 0x171   : > { %v750_v23 = vadd.f32 %v749_v21, %v748_v20  ;;  %v751_v24 = vpop.f32.mrb[2].mxu0 }
 0x172   : > { %v752_v25 = vpop.f32.mrb[3].mxu0 }
 0x173   : > { %v535_v27 = vadd.f32 %v750_v23, %v724_v22 }
 0x175   : > { %v537_v28 = vadd.f32 %v536_v26, %v535_v27 }
 0x177   : > { %538 = vadd.xlane.f32.xlu0 %v537_v28 }
 0x204   : > { %v539_v29 = vpop.xlane.xlu0 %538 }
 0x205   : > { %v540_v30 = vmul.f32 0.0078125, %v539_v29 }
 0x207   : > { %v541_v31 = vsub.f32 %v537_v28, %v540_v30 }
 0x209   : > { %v542_v32 = vmul.f32 %v541_v31, %v541_v31 }
 0x20b   : > { %543 = vadd.xlane.f32.xlu0 %v542_v32 }
 0x298   : > { %v544_v33 = vpop.xlane.xlu0 %543 }
 0x299   : > { %v545_v34 = vmul.f32 0.0078125, %v544_v33 }
 0x29b   : > { %v546_v35 = vadd.f32 1e-12, %v545_v34 }
 0x29d   : > { %850 = vrsqrt.f32 %v546_v35 }
 0x2a7   : > { %v851_v36 = vpop.eup %850 }
 0x2a8   : > { %v548_v38 = vmul.f32 %v851_v36, %v541_v31 }
 0x2aa   : > { %v556_v40 = vmul.f32 %v725_v37, %v548_v38 }
 0x2ac   : > { %v564_v41 = vadd.f32 %v726_v39, %v556_v40 }
 0x2ae   : > { %565 = vst [vmem:[%s340_s30] sm:$0xff] %v564_v41 }
 0x2af   : > { %953 = shalt.err (!%p950_p8)
}
 0x2b0   : > { %s954_s9 = scalar_lea.hbm %s1304_s23, 128  ;;  %s958_s17 = scalar_lea.hbm %s1359_s6, 256 }
 0x2b1   : > { %p955_p10 = scmp.ne.s32.totalorder %s1304_s23, %s954_s9  ;;  %p959_p3 = scmp.lt.u32.totalorder %s1304_s23, %s1359_s6 }
 0x2b2   : > { %p960_p11 = scmp.lt.u32.totalorder %s958_s17, %s954_s9  ;;  %p962_p4 = scmp.lt.u32.totalorder %s954_s9, %s1304_s23 }
 0x2b3   : > { %p956_p13 = pnand %p955_p10, %p1389_p6 }
 0x2b4   : > { %p961_p2 = por %p960_p11, %p959_p3 }
 0x2b5   : > { %p957_p7 = pneg %p956_p13 }
 0x2b6   : > { %p963_p0 = por %p962_p4, %p961_p2 }
 0x2b8   : > { %p964_p12 = pnand %p963_p0, %p957_p7 }
 0x2ba   : > { %967 = shalt.err (!%p964_p12)
}
 0x2bb   : > { %762 = dma.vmem_to_hbm [thread:$0]  (%p1389_p6), %s1306_s8, 128, %s1304_s23, %s567_s27  }
 0x2bc PF: > { %s592_s28 = sand.u32 1, %s1010_s21   ;;  %p1390_p1 = scmp.ne.s32.totalorder %s1379_s16, 0 }
 0x2bd   : > { %p1391_p9 = scmp.ge.s32.totalorder %s1030_s26, 2  ;;  %s593_s11 = scalar_lea.sflag [#allocation5], %s592_s28 }
 0x2bf   : > { %p776_p5 = pnand %p1391_p9, %p1390_p1 }
 0x2c1   : > { %1005 = dma.done.wait (!%p776_p5), %s593_s11, 128  }
 0x2c2   : > { %1007 = vsyncadd (!%p776_p5), %s593_s11, 4294967168  ;;  %s23_s26 = sadd.s32 1, %s1030_s26   ;;  %s1392_s20 = sld [smem:[#allocation14_spill]] }
 0x2c3   : > { %p20_p8 = scmp.ge.s32.totalorder %s23_s26, 4   ;;  %s1393_s23 = sld [smem:[#allocation17_spill]] }
 0x2c4   : > { %s1394_s24 = sld [smem:[#allocation15_spill]]  ;;  %s1395_s25 = sld [smem:[#allocation16_spill]] }
 0x2c5   : > { %s1396_s21 = smov %s1014_s22  ;;  %22 = sbr.rel (!%p20_p8) target bundleno = 9 (0x9), region = 113 }
 0x2c8   : > { %s1397_s22 = smov %s1392_s20 }
 0x2cc   :  { %598 = vsyncpa [#allocation4], 1 }
 0x2cd   :  { %600 = vsyncpa [#allocation4 + $0x1], 1 }
 0x2ce   :  { %601 = vsyncpa [#allocation7], 1 }
 0x2cf   :  { %602 = vsyncpa [#allocation5], 1 }
 0x2d0   :  { %604 = vsyncpa [#allocation5 + $0x1], 1 }

</bundles_post_ra>
